<compile_context>
chip_gen: v6e
topology: v6e:2x2x1
jax: 0.10.0
libtpu: 0.0.40
codegen_flags: <defaults>
</compile_context>

<pallas_src>
import functools

import numpy as np

import jax
import jax.numpy as jnp
from jax.experimental import pallas as pl
from jax.experimental.pallas import tpu as pltpu

_LANE = 128
_SUBLANE = 8

# Per-lane (per batch column) VMEM footprint in bytes, accounting for sublane padding:
#   x block  (D<=8 -> padded to 8 sublanes, tb) f32, double-buffered : 2 * 32 B
#   out block (1   -> padded to 8 sublanes, tb) f32, double-buffered : 2 * 32 B
#   whole-tile temporaries (h, dot result, tree levels), generous    : ~224 B
_VMEM_BYTES_PER_LANE = 352
_VMEM_TILE_BUDGET = 40 * 1024 * 1024     # v7x-safe (64 MiB physical per TensorCore)
_VMEM_LIMIT_CAP = 48 * 1024 * 1024


def _cdiv(a: int, b: int) -> int:
    return -(-a // b)


def _round_up(x: int, m: int) -> int:
    return ((x + m - 1) // m) * m


def _tensor_poly_kernel(x_ref, w_ref, b_ref, o_ref, *, use_mxu: bool):
    """Fused linear-factor evaluation + binary-tree product, lane-dense layout.

    x_ref: (D, TB)   batch tile, batch on the lane axis
    w_ref: (Np, D)   nn.Linear weight (rows = factors), Np = padded factor count
    b_ref: (Np, 1)   nn.Linear bias (the polynomial roots), padded with 1.0
    o_ref: (1, TB)   product over the Np factors for each batch column
    """
    x = x_ref[...]                                   # (D, TB)  f32
    w = w_ref[...]                                   # (Np, D)  f32
    b = b_ref[...]                                   # (Np, 1)  f32

    if use_mxu:
        # Offload the tiny-K contraction to the (otherwise idle) MXU so the VALU
        # only does the bias add and the product tree. HIGHEST keeps full f32.
        h = jnp.dot(w, x, preferred_element_type=jnp.float32,
                    precision=jax.lax.Precision.HIGHEST) + b     # (Np, TB)
    else:
        # VPU broadcast-FMA path (known-good fallback; no MXU round-trip).
        d_dim = x.shape[0]
        h = w[:, 0:1] * x[0:1, :]
        for d in range(1, d_dim):
            h = h + w[:, d:d + 1] * x[d:d + 1, :]
        h = h + b                                    # (Np, TB)

    # Binary-tree pairwise product over the sublane (factor) axis: Np -> ... -> 1
    # (mirrors BiTreeProd; Np is a power of two by construction in the wrapper).
    p = h
    while p.shape[0] > 1:
        half = p.shape[0] // 2
        p = p[:half, :] * p[half:, :]

    o_ref[...] = p.astype(o_ref.dtype)               # (1, TB), lane-dense store


def _choose_tile(B: int, block_b: int) -> tuple[int, int, int]:
    """Pick (tb, b_pad, grid_n): VMEM-budgeted lane tile, padded batch, grid size."""
    b128 = _round_up(max(B, 1), _LANE)
    tb_cap = (_VMEM_TILE_BUDGET // _VMEM_BYTES_PER_LANE) // _LANE * _LANE  # ~116K lanes
    tb = max(_LANE, _round_up(min(block_b, tb_cap), _LANE))
    n_tiles = _cdiv(b128, tb)
    if b128 >= 2 * _LANE:
        # >=2 grid steps so dimension_semantics=("parallel",) can shard across
        # v7x's 2 TensorCores; also balances the tiles (minimizes pad waste).
        n_tiles = max(n_tiles, 2)
    tb = _round_up(_cdiv(b128, n_tiles), _LANE)
    grid_n = _cdiv(b128, tb)
    b_pad = tb * grid_n
    return tb, b_pad, grid_n


@functools.lru_cache(maxsize=None)
def _make_fwd(B, D, n_pad, tb, b_pad, use_mxu, vmem_limit):
    grid = (b_pad // tb,)
    kernel = functools.partial(_tensor_poly_kernel, use_mxu=use_mxu)

    flops = b_pad * (2 * n_pad * D + n_pad + (n_pad - 1))
    bytes_accessed = 4 * (D * b_pad + b_pad + n_pad * D + n_pad)

    call = pl.pallas_call(
        kernel,
        out_shape=jax.ShapeDtypeStruct((1, b_pad), jnp.float32),
        grid_spec=pltpu.PrefetchScalarGridSpec(
            num_scalar_prefetch=0,
            grid=grid,
            in_specs=[
                pl.BlockSpec((D, tb), lambda i: (0, i)),        # x: streamed batch tiles
                pl.BlockSpec((n_pad, D), lambda i: (0, 0)),     # w: grid-invariant, resident
                pl.BlockSpec((n_pad, 1), lambda i: (0, 0)),     # b: grid-invariant, resident
            ],
            out_specs=pl.BlockSpec((1, tb), lambda i: (0, i)),  # lane-dense output
        ),
        compiler_params=pltpu.CompilerParams(
            dimension_semantics=("parallel",),                  # batch tiles shard across TCs
            vmem_limit_bytes=int(vmem_limit),
            # Let XLA fuse the transpose/pad producer into the x input DMA (legal-only
            # hint; only on the primary path so the fallback stays maximally plain).
            allow_input_fusion=[True, False, False] if use_mxu else None,
        ),
        cost_estimate=pl.CostEstimate(
            flops=int(flops), transcendentals=0, bytes_accessed=int(bytes_accessed)),
    )

    @jax.jit
    def fwd(x, w, b2d):
        # Lane-dense layout: batch on the last (lane) axis.
        # TODO(synk): ideally upstream provides x as (D, B) so this never hits HBM.
        xt = jnp.pad(jnp.transpose(x), ((0, 0), (0, b_pad - B)))   # (D, b_pad)
        return call(xt, w, b2d)

    return fwd


def tensor_polynomial(x, weight_mat, bias_vec, *, block_b: int = 65536):
    """Wrapper mirroring TensorPolynomial.forward (after poly_init).

    x:          (B, dim)    float32
    weight_mat: (in_N, dim) float32  -- nn.Linear.weight layout (used as-is)
    bias_vec:   (in_N,)     float32  -- nn.Linear.bias (the roots)
    returns:    (B, 1)      float32
    """
    x = jnp.asarray(x, jnp.float32)
    w = jnp.asarray(weight_mat, jnp.float32)          # (N, D)
    b = jnp.asarray(bias_vec, jnp.float32)            # (N,)
    B, D = x.shape
    N = b.shape[0]

    # Pad factor count to a power of two (>= 8 sublanes) with identity factors:
    # w_pad = 0, b_pad = 1  =>  padded factor == 1.0, product unchanged.
    n_pad = max(_SUBLANE, pl.next_power_of_2(N))
    if n_pad != N:
        w = jnp.concatenate([w, jnp.zeros((n_pad - N, D), jnp.float32)], axis=0)
        b = jnp.concatenate([b, jnp.ones((n_pad - N,), jnp.float32)], axis=0)
    b2d = b.reshape(n_pad, 1)

    tb, b_pad, _ = _choose_tile(B, block_b)
    vmem_limit = min(_VMEM_LIMIT_CAP, max(16 * 1024 * 1024, 512 * tb))

    # Primary config = MXU factor evaluation (+ input-fusion hint). If the tiny-K
    # (D=4) matmul ever fails to lower on a given chip, fall back to the
    # known-good VPU broadcast-FMA kernel with identical tiling.
    out, err = None, None
    for use_mxu in (True, False):
        try:
            fwd = _make_fwd(B, D, n_pad, tb, b_pad, use_mxu, vmem_limit)
            out = jax.block_until_ready(fwd(x, w, b2d))
            break
        except Exception as e:      # lowering/compile failure -> try fallback path
            err, out = e, None
    if out is None:
        raise err

    return out[0, :B].reshape(B, 1)


if __name__ == "__main__":
    # Small shapes consistent with the module: dim=4 input features, in_N=8 roots.
    key = jax.random.PRNGKey(0)
    kx, kw, kb = jax.random.split(key, 3)

    B, dim, in_N = 8, 4, 8
    num_L = 3  # TODO(synk): unused post poly_init (ProdNet layers reduce to exact products)

    x = jax.random.normal(kx, (B, dim), dtype=jnp.float32)
    weight_mat = jax.random.normal(kw, (in_N, dim), dtype=jnp.float32) * 0.5  # nn.Linear.weight
    bias_vec = jax.random.normal(kb, (in_N,), dtype=jnp.float32)              # the "roots"

    y = tensor_polynomial(x, weight_mat, bias_vec)
    y = jax.block_until_ready(y)

    # float64 numpy reference (flat product; kernel uses a balanced tree -> fp-assoc only).
    xh = np.asarray(x, np.float64)
    wh = np.asarray(weight_mat, np.float64)
    bh = np.asarray(bias_vec, np.float64)
    y_ref = np.prod(xh @ wh.T + bh[None, :], axis=-1, keepdims=True)

    assert y.shape == (B, 1)
    assert np.allclose(np.asarray(y, np.float64), y_ref, rtol=1e-3, atol=1e-5), (y, y_ref)

    print("KERNEL_OK")
</pallas_src>

<mosaic_0001>
module attributes {stable_mosaic.version = 11 : i64} {
  func.func @_tensor_poly_kernel(%arg0: i32, %arg1: memref<4x128xf32, #tpu.memory_space<vmem>>, %arg2: memref<8x4xf32, #tpu.memory_space<vmem>>, %arg3: memref<8x1xf32, #tpu.memory_space<vmem>>, %arg4: memref<1x128xf32, #tpu.memory_space<vmem>>) attributes {dimension_semantics = [#tpu.dimension_semantics<parallel>], iteration_bounds = array<i64: 1>, scalar_prefetch = 0 : i64, scratch_operands = 0 : i64, tpu.core_type = #tpu.core_type<tc>, window_params = [{transform_indices = @transform_0, window_bounds = array<i64: 4, 128>}, {pipeline_mode = #tpu.pipeline_mode<synchronous>, transform_indices = @transform_1, window_bounds = array<i64: 8, 4>}, {pipeline_mode = #tpu.pipeline_mode<synchronous>, transform_indices = @transform_2, window_bounds = array<i64: 8, 1>}, {transform_indices = @transform_3, window_bounds = array<i64: 1, 128>}]} {
    %c0 = arith.constant 0 : index
    %c0_0 = arith.constant 0 : index
    %0 = vector.load %arg1[%c0, %c0_0] : memref<4x128xf32, #tpu.memory_space<vmem>>, vector<4x128xf32>
    %c0_1 = arith.constant 0 : index
    %c0_2 = arith.constant 0 : index
    %1 = vector.load %arg2[%c0_1, %c0_2] : memref<8x4xf32, #tpu.memory_space<vmem>>, vector<8x4xf32>
    %c0_3 = arith.constant 0 : index
    %c0_4 = arith.constant 0 : index
    %2 = vector.load %arg3[%c0_3, %c0_4] : memref<8x1xf32, #tpu.memory_space<vmem>>, vector<8x1xf32>
    %cst = arith.constant dense<0.000000e+00> : vector<8x128xf32>
    %3 = tpu.matmul %1, %0, %cst {dimension_numbers = #tpu.dot_dimension_numbers<[1], [0], [0], [1], [0, 0, 1, 1], [], []>, precision = #tpu.contract_precision<fp32>} : vector<8x4xf32>, vector<4x128xf32>, vector<8x128xf32> -> vector<8x128xf32>
    %4 = vector.broadcast %2 : vector<8x1xf32> to vector<8x128xf32>
    %5 = arith.addf %3, %4 : vector<8x128xf32>
    %6 = vector.extract_strided_slice %5 {offsets = [0, 0], sizes = [4, 128], strides = [1, 1]} : vector<8x128xf32> to vector<4x128xf32>
    %7 = vector.extract_strided_slice %5 {offsets = [4, 0], sizes = [4, 128], strides = [1, 1]} : vector<8x128xf32> to vector<4x128xf32>
    %8 = arith.mulf %6, %7 : vector<4x128xf32>
    %9 = vector.extract_strided_slice %8 {offsets = [0, 0], sizes = [2, 128], strides = [1, 1]} : vector<4x128xf32> to vector<2x128xf32>
    %10 = vector.extract_strided_slice %8 {offsets = [2, 0], sizes = [2, 128], strides = [1, 1]} : vector<4x128xf32> to vector<2x128xf32>
    %11 = arith.mulf %9, %10 : vector<2x128xf32>
    %12 = vector.extract_strided_slice %11 {offsets = [0, 0], sizes = [1, 128], strides = [1, 1]} : vector<2x128xf32> to vector<1x128xf32>
    %13 = vector.extract_strided_slice %11 {offsets = [1, 0], sizes = [1, 128], strides = [1, 1]} : vector<2x128xf32> to vector<1x128xf32>
    %14 = arith.mulf %12, %13 : vector<1x128xf32>
    %c0_5 = arith.constant 0 : index
    %c0_6 = arith.constant 0 : index
    %15 = vector.load %arg4[%c0_5, %c0_6] : memref<1x128xf32, #tpu.memory_space<vmem>>, vector<1x128xf32>
    tpu.vector_store %arg4[%c0_5, %c0_6], %14 {strides = array<i32>} : memref<1x128xf32, #tpu.memory_space<vmem>>, vector<1x128xf32>,
    return
  }
  func.func @transform_0(%arg0: i32) -> (i32, i32) {
    %c0_i32 = arith.constant 0 : i32
    %c0_i32_0 = arith.constant 0 : i32
    return %c0_i32, %arg0 : i32, i32
  }
  func.func @transform_1(%arg0: i32) -> (i32, i32) {
    %c0_i32 = arith.constant 0 : i32
    %c0_i32_0 = arith.constant 0 : i32
    %c0_i32_1 = arith.constant 0 : i32
    return %c0_i32, %c0_i32_0 : i32, i32
  }
  func.func @transform_2(%arg0: i32) -> (i32, i32) {
    %c0_i32 = arith.constant 0 : i32
    %c0_i32_0 = arith.constant 0 : i32
    %c0_i32_1 = arith.constant 0 : i32
    return %c0_i32, %c0_i32_0 : i32, i32
  }
  func.func @transform_3(%arg0: i32) -> (i32, i32) {
    %c0_i32 = arith.constant 0 : i32
    %c0_i32_0 = arith.constant 0 : i32
    return %c0_i32, %arg0 : i32, i32
  }
}

module attributes {stable_mosaic.version = 11 : i64} {
  func.func @_tensor_poly_kernel(%arg0: i32, %arg1: memref<4x128xf32, #tpu.memory_space<vmem>>, %arg2: memref<8x4xf32, #tpu.memory_space<vmem>>, %arg3: memref<8x1xf32, #tpu.memory_space<vmem>>, %arg4: memref<1x128xf32, #tpu.memory_space<vmem>>) attributes {dimension_semantics = [#tpu.dimension_semantics<parallel>], iteration_bounds = array<i64: 1>, scalar_prefetch = 0 : i64, scratch_operands = 0 : i64, tpu.core_type = #tpu.core_type<tc>, window_params = [{transform_indices = @transform_0, window_bounds = array<i64: 4, 128>}, {pipeline_mode = #tpu.pipeline_mode<synchronous>, transform_indices = @transform_1, window_bounds = array<i64: 8, 4>}, {pipeline_mode = #tpu.pipeline_mode<synchronous>, transform_indices = @transform_2, window_bounds = array<i64: 8, 1>}, {transform_indices = @transform_3, window_bounds = array<i64: 1, 128>}]} {
    %c0 = arith.constant 0 : index
    %c0_0 = arith.constant 0 : index
    %0 = vector.load %arg1[%c0, %c0_0] : memref<4x128xf32, #tpu.memory_space<vmem>>, vector<4x128xf32>
    %c0_1 = arith.constant 0 : index
    %c0_2 = arith.constant 0 : index
    %1 = vector.load %arg2[%c0_1, %c0_2] : memref<8x4xf32, #tpu.memory_space<vmem>>, vector<8x4xf32>
    %c0_3 = arith.constant 0 : index
    %c0_4 = arith.constant 0 : index
    %2 = vector.load %arg3[%c0_3, %c0_4] : memref<8x1xf32, #tpu.memory_space<vmem>>, vector<8x1xf32>
    %3 = vector.extract_strided_slice %1 {offsets = [0, 0], sizes = [8, 1], strides = [1, 1]} : vector<8x4xf32> to vector<8x1xf32>
    %4 = vector.extract_strided_slice %0 {offsets = [0, 0], sizes = [1, 128], strides = [1, 1]} : vector<4x128xf32> to vector<1x128xf32>
    %5 = vector.broadcast %3 : vector<8x1xf32> to vector<8x128xf32>
    %6 = vector.broadcast %4 : vector<1x128xf32> to vector<8x128xf32>
    %7 = arith.mulf %5, %6 : vector<8x128xf32>
    %8 = vector.extract_strided_slice %1 {offsets = [0, 1], sizes = [8, 1], strides = [1, 1]} : vector<8x4xf32> to vector<8x1xf32>
    %9 = vector.extract_strided_slice %0 {offsets = [1, 0], sizes = [1, 128], strides = [1, 1]} : vector<4x128xf32> to vector<1x128xf32>
    %10 = vector.broadcast %8 : vector<8x1xf32> to vector<8x128xf32>
    %11 = vector.broadcast %9 : vector<1x128xf32> to vector<8x128xf32>
    %12 = arith.mulf %10, %11 : vector<8x128xf32>
    %13 = arith.addf %7, %12 : vector<8x128xf32>
    %14 = vector.extract_strided_slice %1 {offsets = [0, 2], sizes = [8, 1], strides = [1, 1]} : vector<8x4xf32> to vector<8x1xf32>
    %15 = vector.extract_strided_slice %0 {offsets = [2, 0], sizes = [1, 128], strides = [1, 1]} : vector<4x128xf32> to vector<1x128xf32>
    %16 = vector.broadcast %14 : vector<8x1xf32> to vector<8x128xf32>
    %17 = vector.broadcast %15 : vector<1x128xf32> to vector<8x128xf32>
    %18 = arith.mulf %16, %17 : vector<8x128xf32>
    %19 = arith.addf %13, %18 : vector<8x128xf32>
    %20 = vector.extract_strided_slice %1 {offsets = [0, 3], sizes = [8, 1], strides = [1, 1]} : vector<8x4xf32> to vector<8x1xf32>
    %21 = vector.extract_strided_slice %0 {offsets = [3, 0], sizes = [1, 128], strides = [1, 1]} : vector<4x128xf32> to vector<1x128xf32>
    %22 = vector.broadcast %20 : vector<8x1xf32> to vector<8x128xf32>
    %23 = vector.broadcast %21 : vector<1x128xf32> to vector<8x128xf32>
    %24 = arith.mulf %22, %23 : vector<8x128xf32>
    %25 = arith.addf %19, %24 : vector<8x128xf32>
    %26 = vector.broadcast %2 : vector<8x1xf32> to vector<8x128xf32>
    %27 = arith.addf %25, %26 : vector<8x128xf32>
    %28 = vector.extract_strided_slice %27 {offsets = [0, 0], sizes = [4, 128], strides = [1, 1]} : vector<8x128xf32> to vector<4x128xf32>
    %29 = vector.extract_strided_slice %27 {offsets = [4, 0], sizes = [4, 128], strides = [1, 1]} : vector<8x128xf32> to vector<4x128xf32>
    %30 = arith.mulf %28, %29 : vector<4x128xf32>
    %31 = vector.extract_strided_slice %30 {offsets = [0, 0], sizes = [2, 128], strides = [1, 1]} : vector<4x128xf32> to vector<2x128xf32>
    %32 = vector.extract_strided_slice %30 {offsets = [2, 0], sizes = [2, 128], strides = [1, 1]} : vector<4x128xf32> to vector<2x128xf32>
    %33 = arith.mulf %31, %32 : vector<2x128xf32>
    %34 = vector.extract_strided_slice %33 {offsets = [0, 0], sizes = [1, 128], strides = [1, 1]} : vector<2x128xf32> to vector<1x128xf32>
    %35 = vector.extract_strided_slice %33 {offsets = [1, 0], sizes = [1, 128], strides = [1, 1]} : vector<2x128xf32> to vector<1x128xf32>
    %36 = arith.mulf %34, %35 : vector<1x128xf32>
    %c0_5 = arith.constant 0 : index
    %c0_6 = arith.constant 0 : index
    %37 = vector.load %arg4[%c0_5, %c0_6] : memref<1x128xf32, #tpu.memory_space<vmem>>, vector<1x128xf32>
    tpu.vector_store %arg4[%c0_5, %c0_6], %36 {strides = array<i32>} : memref<1x128xf32, #tpu.memory_space<vmem>>, vector<1x128xf32>,
    return
  }
  func.func @transform_0(%arg0: i32) -> (i32, i32) {
    %c0_i32 = arith.constant 0 : i32
    %c0_i32_0 = arith.constant 0 : i32
    return %c0_i32, %arg0 : i32, i32
  }
  func.func @transform_1(%arg0: i32) -> (i32, i32) {
    %c0_i32 = arith.constant 0 : i32
    %c0_i32_0 = arith.constant 0 : i32
    %c0_i32_1 = arith.constant 0 : i32
    return %c0_i32, %c0_i32_0 : i32, i32
  }
  func.func @transform_2(%arg0: i32) -> (i32, i32) {
    %c0_i32 = arith.constant 0 : i32
    %c0_i32_0 = arith.constant 0 : i32
    %c0_i32_1 = arith.constant 0 : i32
    return %c0_i32, %c0_i32_0 : i32, i32
  }
  func.func @transform_3(%arg0: i32) -> (i32, i32) {
    %c0_i32 = arith.constant 0 : i32
    %c0_i32_0 = arith.constant 0 : i32
    return %c0_i32, %arg0 : i32, i32
  }
}

</mosaic_0001>

<bundles_post_ra>
// kernel: fwd.2
= control target key start
LH: loop header
LB: loop body
LE: loop exit
PB: predicated region body
PF: predicated region fallthrough
CT: control target
= control target key end

     0   :  { %s639_s0 = inlined_call_operand.vmem [shape: f32[8,4], index: 0, kind: input, shape index: {}]   ;;  %s640_s1 = inlined_call_operand.vmem [shape: f32[8,1], index: 1, kind: input, shape index: {}]   ;;  %s641_s2 = inlined_call_operand.vmem [shape: f32[4,8], index: 2, kind: input, shape index: {}]   ;;  %s642_s3 = inlined_call_operand.<no memory space> [shape: f32[], index: 3, kind: input, shape index: {}]   ;;  %s643_s4 = inlined_call_operand.hbm [shape: f32[1,128], index: 4, kind: output, shape index: {}]  }
   0x1   :  { %v9_v0 = vstv %s642_s3 }
   0x2   :  { %v18_v1 = vlaneseq  ;;  %v32_v2 = vld [vmem:[%s639_s0] sm:$0xff]  ;;  %v589_v3 = vmov 0.0   ;;  %vm590_vm0 = vmmov 0   ;;  %vm39_vm1 = vcmask 31744  }
   0x3   :  { %532 = vmatprep.subr.mxu0 %v589_v3  ;;  %534 = vmatprep.mubr.msk.f32.mxu0 %vm590_vm0, %v589_v3  ;;  %v33_v4 = vld [vmem:[%s640_s1] sm:$0xff] }
   0x4   :  { %10 = vsyncpa [#allocation8], 0  ;;  %v17_v5 = vld [vmem:[%s641_s2] sm:$0xf]  ;;  %v19_v6 = vshrl.u32 %v18_v1, 7  ;;  %v24_v7 = vand.u32 127, %v18_v1  ;;  %537 = vmatprep.subr.mxu1 %v589_v3  ;;  %539 = vmatprep.mubr.msk.f32.mxu1 %vm590_vm0, %v589_v3 }
   0x5   :  { %v41_v8 = vsel %vm39_vm1, %v32_v2, 0  ;;  %v591_v10 = vmov 0   ;;  %vm43_vm4 = vcmask 1043456   ;;  %s592_s0 = smov [#allocation7]  }
   0x6   :  { %v113_v9 = vand.u32 4294901760, %v41_v8  ;;  %566 = vset.pattern.permute.xlu0 %v591_v10  ;;  %vm21_vm2 = vcmp.lt.s32.totalorder %v19_v6, 4  ;;  %vm26_vm3 = vcmp.lt.s32.totalorder %v24_v7, 8  ;;  %s512_s1 = sshll.u32 %s592_s0, 4  ;;  %s513_s1 = int_to_ptr.vmem [resolvable:$true] %s512_s1 }
   0x7   :  { %36 = vperm.xlu0 %566, %v33_v4   ;;  %v22_v11 = vsel %vm21_vm2, %v17_v5, %v9_v0  ;;  %s567_s2 = scalar_lea.vmem %s513_s1, 16  ;;  %s571_s3 = scalar_lea.vmem %s513_s1, 32 }
   0x8   :  { %v114_v12 = vsub.f32 %v41_v8, %v113_v9  ;;  %v27_v13 = vsel %vm26_vm3, %v22_v11, %v9_v0  ;;  %p568_p0 = scmp.ne.s32.totalorder %s513_s1, %s567_s2  ;;  %p572_p1 = scmp.lt.s32.totalorder %s513_s1, %s513_s1 }
   0x9   :  { %30 = vst [vmem:[#allocation9] sm:$0xf] %v27_v13  ;;  %p573_p2 = scmp.lt.s32.totalorder %s571_s3, %s567_s2 }
   0xa   :  { %v115_v14 = vand.u32 4294901760, %v114_v12 }
   0xb   :  { %p574_p3 = por %p573_p2, %p572_p1 }
   0xc   :  { %v116_v15 = vsub.f32 %v114_v12, %v115_v14 }
   0xd   :  { %p575_p4 = pnand %p574_p3, %p568_p0 }
   0xe   :  { %v117_v18 = vand.u32 4294901760, %v116_v15 }
  0x10   :  { %v31_v16 = vld [vmem:[#allocation9] sm:$0xf] }
  0x11   :  { %v45_v17 = vsel %vm43_vm4, %v31_v16, 0 }
  0x12   :  { %v78_v19 = vand.u32 4294901760, %v45_v17 }
  0x14   :  { %533 = vmatpush3.msra.mxu0 %v78_v19  ;;  %v155_v20 = vsub.f32 %v45_v17, %v78_v19 }
  0x15   :  { %535 = vmatmul.mubr.f32.vlgmr.msra.gmra.mxu0 %v117_v18  ;;  %542 = vmatprep.subr.mxu0 %v589_v3 }
  0x16   :  { %v156_v21 = vand.u32 4294901760, %v155_v20  ;;  %543 = vmatpush3.msra.mxu0 %v155_v20  ;;  %544 = vmatprep.mubr.msk.f32.mxu0 %vm590_vm0, %v589_v3 }
  0x17   :  { %552 = vmatprep.subr.mxu0 %v589_v3 }
  0x18   :  { %v157_v22 = vsub.f32 %v155_v20, %v156_v21 }
  0x19   :  { %545 = vmatmul.mubr.f32.vlgmr.msra.gmra.mxu0 %v114_v12 }
  0x1a   :  { %v158_v23 = vand.u32 4294901760, %v157_v22  ;;  %553 = vmatpush3.msra.mxu0 %v156_v21  ;;  %554 = vmatprep.mubr.msk.f32.mxu0 %vm590_vm0, %v589_v3 }
  0x1c   :  { %538 = vmatpush3.msra.mxu1 %v158_v23 }
  0x1d   :  { %540 = vmatmul.mubr.f32.vlgmr.msra.gmra.mxu1 %v113_v9  ;;  %547 = vmatprep.subr.mxu1 %v589_v3 }
  0x1e   :  { %548 = vmatpush3.msra.mxu1 %v78_v19  ;;  %549 = vmatprep.mubr.msk.f32.mxu1 %vm590_vm0, %v589_v3 }
  0x1f   :  { %557 = vmatprep.subr.mxu1 %v589_v3  ;;  %555 = vmatmul.mubr.f32.vlgmr.msra.gmra.mxu0 %v113_v9 }
  0x21   :  { %550 = vmatmul.mubr.f32.vlgmr.msra.gmra.mxu1 %v115_v14 }
  0x22   :  { %558 = vmatpush3.msra.mxu1 %v78_v19  ;;  %559 = vmatprep.mubr.msk.f32.mxu1 %vm590_vm0, %v589_v3 }
  0x25   :  { %560 = vmatmul.mubr.f32.vlgmr.msra.gmra.mxu1 %v113_v9 }
  0x82   :  { %v37_v25 = vpop.permute.xlu0 %36 }
  0xd5   :  { %v119_v24 = vpop.f32.mrf.mxu0 }
  0xd6   :  { %v120_v28 = vadd.f32 %v119_v24, %v37_v25 }
  0xd7   :  { %v536_v26 = vpop.f32.mrf.mxu0 }
  0xd9   :  { %v269_v27 = vpop.f32.mrf.mxu0 }
  0xdb   :  { %v546_v29 = vpop.f32.mrf.mxu0 }
  0xdd   :  { %v195_v30 = vpop.f32.mrf.mxu1 }
  0xde   :  { %v196_v31 = vadd.f32 %v195_v30, %v120_v28 }
  0xdf   :  { %v541_v32 = vpop.f32.mrf.mxu1  ;;  %v417_v33 = vpop.f32.mrf.mxu0 }
  0xe0   :  { %v270_v34 = vadd.f32 %v269_v27, %v196_v31 }
  0xe1   :  { %v343_v35 = vpop.f32.mrf.mxu1  ;;  %v556_v36 = vpop.f32.mrf.mxu0 }
  0xe2   :  { %v344_v37 = vadd.f32 %v343_v35, %v270_v34 }
  0xe3   :  { %v551_v38 = vpop.f32.mrf.mxu1 }
  0xe4   :  { %v418_v39 = vadd.f32 %v417_v33, %v344_v37 }
  0xe5   :  { %v489_v40 = vpop.f32.mrf.mxu1 }
  0xe6   :  { %v490_v41 = vadd.f32 %v489_v40, %v418_v39 }
  0xe7   :  { %v561_v42 = vpop.f32.mrf.mxu1 }
  0xe8   :  { %v494_v43 = vrot.slane %v490_v41, 4 }
  0xea   :  { %v496_v44 = vmul.f32 %v494_v43, %v490_v41 }
  0xec   :  { %v498_v45 = vrot.slane %v496_v44, 2 }
  0xee   :  { %v500_v46 = vmul.f32 %v498_v45, %v496_v44 }
  0xf0   :  { %v502_v47 = vrot.slane %v500_v46, 1 }
  0xf2   :  { %v504_v48 = vmul.f32 %v502_v47, %v500_v46 }
  0xf4   :  { %505 = vst [vmem:[#allocation7] sm:$0x1] %v504_v48 }
  0xf5   :  { %578 = shalt.err (!%p575_p4)
}
  0xf6   :  { %515 = dma.vmem_to_hbm [thread:$0]  %s513_s1, 16, %s643_s4, [#allocation8]  }
  0xf7   :  { %587 = dma.done.wait [#allocation8], 16  }
  0xf8   :  { %588 = vsyncadd [#allocation8], 4294967280 }
  0xf9   :  { %519 = vsyncpa [#allocation8], 1 }

// kernel: fwd.1
= control target key start
LH: loop header
LB: loop body
LE: loop exit
PB: predicated region body
PF: predicated region fallthrough
CT: control target
= control target key end

     0   :  { %v124_v1 = vmov 0   ;;  %v125_v2 = vmov 2   ;;  %s161_s0 = inlined_call_operand.vmem [shape: f32[4,128], index: 0, kind: input, shape index: {}]   ;;  %s162_s1 = inlined_call_operand.vmem [shape: f32[8,4], index: 1, kind: input, shape index: {}]   ;;  %s163_s2 = inlined_call_operand.vmem [shape: f32[8,1], index: 2, kind: input, shape index: {}]   ;;  %s164_s3 = inlined_call_operand.hbm [shape: f32[1,128], index: 3, kind: output, shape index: {}]  }
   0x1   :  { %v16_v0 = vld [vmem:[%s162_s1] sm:$0xff]  ;;  %96 = vset.pattern.permute.xlu0 %v124_v1  ;;  %98 = vset.pattern.permute.xlu1 %v125_v2 }
   0x2   :  { %8 = vsyncpa [#allocation3], 0  ;;  %20 = vperm.xlu0 %96, %v16_v0   ;;  %39 = vperm.xlu1 %98, %v16_v0   ;;  %v126_v3 = vmov 1   ;;  %v127_v4 = vmov 3   ;;  %v17_v5 = vld [vmem:[%s163_s2] sm:$0xff]  ;;  %v23_v6 = vlaneseq }
   0x3   :  { %v15_v10 = vld [vmem:[%s161_s0] sm:$0xf]  ;;  %s128_s0 = smov [#allocation2]  }
   0x4   :  { %v24_v7 = vshrl.u32 %v23_v6, 7  ;;  %s83_s2 = sshll.u32 %s128_s0, 4  ;;  %s84_s2 = int_to_ptr.vmem [resolvable:$true] %s83_s2 }
   0x5   :  { %s102_s17 = scalar_lea.vmem %s84_s2, 16  ;;  %s106_s18 = scalar_lea.vmem %s84_s2, 32 }
   0x6   :  { %97 = vset.pattern.permute.xlu0 %v126_v3  ;;  %99 = vset.pattern.permute.xlu1 %v127_v4  ;;  %v25_v8 = vsub.s32 0, %v24_v7  ;;  %v34_v9 = vsub.s32 1, %v24_v7  ;;  %v44_v12 = vsub.s32 2, %v24_v7  ;;  %v54_v14 = vsub.s32 3, %v24_v7  ;;  %p103_p0 = scmp.ne.s32.totalorder %s84_s2, %s102_s17  ;;  %p107_p1 = scmp.lt.s32.totalorder %s84_s2, %s84_s2 }
   0x7   :  { %29 = vperm.xlu0 %97, %v16_v0   ;;  %49 = vperm.xlu1 %99, %v16_v0   ;;  %p108_p2 = scmp.lt.s32.totalorder %s106_s18, %s102_s17 }
   0x8   :  { %v26_v15 = vrot.slane %v15_v10, %v25_v8  ;;  %v35_v16 = vrot.slane %v15_v10, %v34_v9  ;;  %v45_v17 = vrot.slane %v15_v10, %v44_v12  ;;  %v55_v18 = vrot.slane %v15_v10, %v54_v14 }
   0x9   :  { %p109_p3 = por %p108_p2, %p107_p1 }
   0xb   :  { %100 = vset.pattern.permute.xlu1 %v124_v1  ;;  %101 = vset.pattern.permute.xlu0 %v124_v1  ;;  %p110_p4 = pnand %p109_p3, %p103_p0 }
   0xc   :  { %60 = vperm.xlu1 %100, %v17_v5  }
  0x7d   :  { %v21_v11 = vpop.permute.xlu0 %20  ;;  %v40_v13 = vpop.permute.xlu1 %39 }
  0x7e   :  { %v27_v21 = vmul.f32 %v26_v15, %v21_v11  ;;  %v46_v23 = vmul.f32 %v45_v17, %v40_v13 }
  0x82   :  { %v30_v19 = vpop.permute.xlu0 %29  ;;  %v50_v20 = vpop.permute.xlu1 %49 }
  0x83   :  { %v36_v22 = vmul.f32 %v35_v16, %v30_v19  ;;  %v56_v25 = vmul.f32 %v55_v18, %v50_v20 }
  0x85   :  { %v37_v24 = vadd.f32 %v36_v22, %v27_v21 }
  0x87   :  { %v47_v26 = vadd.f32 %v46_v23, %v37_v24  ;;  %v61_v27 = vpop.permute.xlu1 %60 }
  0x89   :  { %v57_v28 = vadd.f32 %v56_v25, %v47_v26 }
  0x8b   :  { %v63_v29 = vadd.f32 %v61_v27, %v57_v28 }
  0x8d   :  { %v65_v30 = vrot.slane %v63_v29, 4 }
  0x8f   :  { %v67_v31 = vmul.f32 %v65_v30, %v63_v29 }
  0x91   :  { %v69_v32 = vrot.slane %v67_v31, 2 }
  0x93   :  { %v71_v33 = vmul.f32 %v69_v32, %v67_v31 }
  0x95   :  { %v73_v34 = vrot.slane %v71_v33, 1 }
  0x97   :  { %v75_v35 = vmul.f32 %v73_v34, %v71_v33 }
  0x99   :  { %76 = vst [vmem:[#allocation2] sm:$0x1] %v75_v35 }
  0x9a   :  { %113 = shalt.err (!%p110_p4)
}
  0x9b   :  { %86 = dma.vmem_to_hbm [thread:$0]  %s84_s2, 16, %s164_s3, [#allocation3]  }
  0x9c   :  { %122 = dma.done.wait [#allocation3], 16  }
  0x9d   :  { %123 = vsyncadd [#allocation3], 4294967280 }
  0x9e   :  { %90 = vsyncpa [#allocation3], 1 }

</bundles_post_ra>
